<compile_context>
chip_gen: v6e
topology: v6e:2x2x1
jax: 0.10.0
libtpu: 0.0.40
codegen_flags: <defaults>
</compile_context>

<pallas_src>
import functools
import math

import jax
import jax.numpy as jnp
from jax.experimental import pallas as pl
from jax.experimental.pallas import tpu as pltpu


def _round_up(x, m):
    return (x + m - 1) // m * m


def dqn_kernel(x_ref, w1_ref, b1_ref, w2_ref, b2_ref,
               w3_ref, b3_ref, w4_ref, b4_ref, out_ref):
    # Matmuls run in the weights' dtype (f32 or bf16) on the MXU with an f32
    # accumulator; bias + ReLU epilogues stay in f32 on the VPU.
    cd = w1_ref.dtype
    h = jnp.dot(x_ref[...].astype(cd), w1_ref[...],
                preferred_element_type=jnp.float32)
    h = jnp.maximum(h + b1_ref[...], 0.0)
    h = jnp.dot(h.astype(cd), w2_ref[...], preferred_element_type=jnp.float32)
    h = jnp.maximum(h + b2_ref[...], 0.0)
    h = jnp.dot(h.astype(cd), w3_ref[...], preferred_element_type=jnp.float32)
    h = jnp.maximum(h + b3_ref[...], 0.0)
    h = jnp.dot(h.astype(cd), w4_ref[...], preferred_element_type=jnp.float32)
    out_ref[...] = (h + b4_ref[...]).astype(out_ref.dtype)


@functools.partial(jax.jit, static_argnames=("matmul_dtype", "batch_tile"))
def dqn_forward(state, params, *, matmul_dtype=jnp.float32, batch_tile=256):
    """state: (B, input_dim) float32. params: dict of transposed weights/biases."""
    B, in_dim = state.shape
    n_actions = params["w4"].shape[1]

    # Batch tile: multiple of 8 sublanes; stream the batch, keep weights resident.
    TB = _round_up(min(batch_tile, _round_up(B, 8)), 8)
    B_pad = _round_up(B, TB)
    # Lane-dense output: pad n_actions up to a full 128-lane vreg (unmasked vst).
    N_pad = _round_up(n_actions, 128)

    cd = jnp.dtype(matmul_dtype)
    w1 = params["w1"].astype(cd)
    w2 = params["w2"].astype(cd)
    w3 = params["w3"].astype(cd)
    w4 = jnp.zeros((params["w4"].shape[0], N_pad), cd).at[:, :n_actions].set(
        params["w4"].astype(cd))
    b1, b2, b3 = params["b1"], params["b2"], params["b3"]
    b4 = jnp.zeros((1, N_pad), jnp.float32).at[:, :n_actions].set(params["b4"])

    x = jnp.zeros((B_pad, in_dim), state.dtype).at[:B, :].set(state)

    fc1, fc2, fc3 = w1.shape[1], w2.shape[1], w3.shape[1]
    flops = 2 * B_pad * (in_dim * fc1 + fc1 * fc2 + fc2 * fc3 + fc3 * N_pad)
    bytes_accessed = (
        x.size * x.dtype.itemsize
        + sum(int(a.size) * a.dtype.itemsize
              for a in (w1, b1, w2, b2, w3, b3, w4, b4))
        + B_pad * N_pad * 4)

    def resident(arr):
        # Same block index at every grid step -> stays resident in VMEM.
        return pl.BlockSpec(arr.shape, lambda i: (0, 0))

    out = pl.pallas_call(
        dqn_kernel,
        out_shape=jax.ShapeDtypeStruct((B_pad, N_pad), jnp.float32),
        grid=(B_pad // TB,),
        in_specs=[
            pl.BlockSpec((TB, in_dim), lambda i: (i, 0)),   # streamed activations
            resident(w1), resident(b1),
            resident(w2), resident(b2),
            resident(w3), resident(b3),
            resident(w4), resident(b4),
        ],
        out_specs=pl.BlockSpec((TB, N_pad), lambda i: (i, 0)),
        compiler_params=pltpu.CompilerParams(
            dimension_semantics=("parallel",)),   # shards batch tiles across v7x's 2 TCs
        cost_estimate=pl.CostEstimate(
            flops=flops, transcendentals=0, bytes_accessed=bytes_accessed),
    )(x, w1, b1, w2, b2, w3, b3, w4, b4)

    return out[:B, :n_actions]


def init_linear(key, fan_in, fan_out):
    """Deterministic PyTorch-style nn.Linear init; returns W^T (in, out) and b (1, out)."""
    kw, kb = jax.random.split(key)
    bound = 1.0 / math.sqrt(fan_in)
    w_t = jax.random.uniform(kw, (fan_in, fan_out), jnp.float32, -bound, bound)
    b = jax.random.uniform(kb, (1, fan_out), jnp.float32, -bound, bound)
    return w_t, b


if __name__ == "__main__":
    # DQN(ALPHA, input_dims=(32,), fc1_dims=64, fc2_dims=64, fc3_dims=32, n_actions=8)
    input_dim, fc1_dims, fc2_dims, fc3_dims, n_actions = 32, 64, 64, 32, 8

    key = jax.random.PRNGKey(0)
    k_x, k_xl, k1, k2, k3, k4 = jax.random.split(key, 6)

    w1, b1 = init_linear(k1, input_dim, fc1_dims)
    w2, b2 = init_linear(k2, fc1_dims, fc2_dims)
    w3, b3 = init_linear(k3, fc2_dims, fc3_dims)
    w4, b4 = init_linear(k4, fc3_dims, n_actions)
    params = dict(w1=w1, b1=b1, w2=w2, b2=b2, w3=w3, b3=b3, w4=w4, b4=b4)

    def ref_fwd(x, cd=jnp.float32):
        h = jnp.maximum(jnp.dot(x.astype(cd), w1.astype(cd),
                                preferred_element_type=jnp.float32) + b1, 0.0)
        h = jnp.maximum(jnp.dot(h.astype(cd), w2.astype(cd),
                                preferred_element_type=jnp.float32) + b2, 0.0)
        h = jnp.maximum(jnp.dot(h.astype(cd), w3.astype(cd),
                                preferred_element_type=jnp.float32) + b3, 0.0)
        return jnp.dot(h.astype(cd), w4.astype(cd),
                       preferred_element_type=jnp.float32) + b4

    # 1) Small inference-style batch (f32, single grid step after padding to 8).
    batch_small = 4
    state_small = jax.random.normal(k_x, (batch_small, input_dim), jnp.float32)
    out_small = jax.block_until_ready(dqn_forward(state_small, params))
    assert out_small.shape == (batch_small, n_actions)
    assert jnp.allclose(out_small, ref_fwd(state_small), atol=1e-4, rtol=1e-4)

    # 2) Replay-buffer-sized batch (f32, multi-step batch grid, weights resident).
    batch_large = 512
    state_large = jax.random.normal(k_xl, (batch_large, input_dim), jnp.float32)
    out_large = jax.block_until_ready(dqn_forward(state_large, params))
    assert out_large.shape == (batch_large, n_actions)
    assert jnp.allclose(out_large, ref_fwd(state_large), atol=1e-4, rtol=1e-4)

    # 3) bf16 matmul path (one MXU pass per layer on v6e/v7x, half the weight DMA).
    out_bf16 = jax.block_until_ready(
        dqn_forward(state_large, params, matmul_dtype=jnp.bfloat16))
    assert jnp.allclose(out_bf16, ref_fwd(state_large, jnp.bfloat16),
                        atol=2e-2, rtol=2e-2)

    print("KERNEL_OK")
</pallas_src>

<mosaic_0001>
module attributes {stable_mosaic.version = 11 : i64} {
  func.func @dqn_kernel(%arg0: i32, %arg1: memref<8x32xf32, #tpu.memory_space<vmem>>, %arg2: memref<32x64xf32, #tpu.memory_space<vmem>>, %arg3: memref<1x64xf32, #tpu.memory_space<vmem>>, %arg4: memref<64x64xf32, #tpu.memory_space<vmem>>, %arg5: memref<1x64xf32, #tpu.memory_space<vmem>>, %arg6: memref<64x32xf32, #tpu.memory_space<vmem>>, %arg7: memref<1x32xf32, #tpu.memory_space<vmem>>, %arg8: memref<32x128xf32, #tpu.memory_space<vmem>>, %arg9: memref<1x128xf32, #tpu.memory_space<vmem>>, %arg10: memref<8x128xf32, #tpu.memory_space<vmem>>) attributes {dimension_semantics = [#tpu.dimension_semantics<parallel>], iteration_bounds = array<i64: 1>, scalar_prefetch = 0 : i64, scratch_operands = 0 : i64, tpu.core_type = #tpu.core_type<tc>, window_params = [{transform_indices = @transform_0, window_bounds = array<i64: 8, 32>}, {pipeline_mode = #tpu.pipeline_mode<synchronous>, transform_indices = @transform_1, window_bounds = array<i64: 32, 64>}, {pipeline_mode = #tpu.pipeline_mode<synchronous>, transform_indices = @transform_2, window_bounds = array<i64: 1, 64>}, {pipeline_mode = #tpu.pipeline_mode<synchronous>, transform_indices = @transform_3, window_bounds = array<i64: 64, 64>}, {pipeline_mode = #tpu.pipeline_mode<synchronous>, transform_indices = @transform_4, window_bounds = array<i64: 1, 64>}, {pipeline_mode = #tpu.pipeline_mode<synchronous>, transform_indices = @transform_5, window_bounds = array<i64: 64, 32>}, {pipeline_mode = #tpu.pipeline_mode<synchronous>, transform_indices = @transform_6, window_bounds = array<i64: 1, 32>}, {pipeline_mode = #tpu.pipeline_mode<synchronous>, transform_indices = @transform_7, window_bounds = array<i64: 32, 128>}, {pipeline_mode = #tpu.pipeline_mode<synchronous>, transform_indices = @transform_8, window_bounds = array<i64: 1, 128>}, {transform_indices = @transform_9, window_bounds = array<i64: 8, 128>}]} {
    %c0 = arith.constant 0 : index
    %c0_0 = arith.constant 0 : index
    %0 = vector.load %arg1[%c0, %c0_0] : memref<8x32xf32, #tpu.memory_space<vmem>>, vector<8x32xf32>
    %c0_1 = arith.constant 0 : index
    %c0_2 = arith.constant 0 : index
    %1 = vector.load %arg2[%c0_1, %c0_2] : memref<32x64xf32, #tpu.memory_space<vmem>>, vector<32x64xf32>
    %cst = arith.constant dense<0.000000e+00> : vector<8x64xf32>
    %2 = tpu.matmul %0, %1, %cst {dimension_numbers = #tpu.dot_dimension_numbers<[1], [0], [0], [1], [0, 0, 1, 1], [], []>} : vector<8x32xf32>, vector<32x64xf32>, vector<8x64xf32> -> vector<8x64xf32>
    %c0_3 = arith.constant 0 : index
    %c0_4 = arith.constant 0 : index
    %3 = vector.load %arg3[%c0_3, %c0_4] : memref<1x64xf32, #tpu.memory_space<vmem>>, vector<1x64xf32>
    %4 = vector.broadcast %3 : vector<1x64xf32> to vector<8x64xf32>
    %5 = arith.addf %2, %4 : vector<8x64xf32>
    %cst_5 = arith.constant 0.000000e+00 : f32
    %6 = vector.broadcast %cst_5 : f32 to vector<8x64xf32>
    %7 = arith.maximumf %5, %6 : vector<8x64xf32>
    %c0_6 = arith.constant 0 : index
    %c0_7 = arith.constant 0 : index
    %8 = vector.load %arg4[%c0_6, %c0_7] : memref<64x64xf32, #tpu.memory_space<vmem>>, vector<64x64xf32>
    %cst_8 = arith.constant dense<0.000000e+00> : vector<8x64xf32>
    %9 = tpu.matmul %7, %8, %cst_8 {dimension_numbers = #tpu.dot_dimension_numbers<[1], [0], [0], [1], [0, 0, 1, 1], [], []>} : vector<8x64xf32>, vector<64x64xf32>, vector<8x64xf32> -> vector<8x64xf32>
    %c0_9 = arith.constant 0 : index
    %c0_10 = arith.constant 0 : index
    %10 = vector.load %arg5[%c0_9, %c0_10] : memref<1x64xf32, #tpu.memory_space<vmem>>, vector<1x64xf32>
    %11 = vector.broadcast %10 : vector<1x64xf32> to vector<8x64xf32>
    %12 = arith.addf %9, %11 : vector<8x64xf32>
    %cst_11 = arith.constant 0.000000e+00 : f32
    %13 = vector.broadcast %cst_11 : f32 to vector<8x64xf32>
    %14 = arith.maximumf %12, %13 : vector<8x64xf32>
    %c0_12 = arith.constant 0 : index
    %c0_13 = arith.constant 0 : index
    %15 = vector.load %arg6[%c0_12, %c0_13] : memref<64x32xf32, #tpu.memory_space<vmem>>, vector<64x32xf32>
    %cst_14 = arith.constant dense<0.000000e+00> : vector<8x32xf32>
    %16 = tpu.matmul %14, %15, %cst_14 {dimension_numbers = #tpu.dot_dimension_numbers<[1], [0], [0], [1], [0, 0, 1, 1], [], []>} : vector<8x64xf32>, vector<64x32xf32>, vector<8x32xf32> -> vector<8x32xf32>
    %c0_15 = arith.constant 0 : index
    %c0_16 = arith.constant 0 : index
    %17 = vector.load %arg7[%c0_15, %c0_16] : memref<1x32xf32, #tpu.memory_space<vmem>>, vector<1x32xf32>
    %18 = vector.broadcast %17 : vector<1x32xf32> to vector<8x32xf32>
    %19 = arith.addf %16, %18 : vector<8x32xf32>
    %cst_17 = arith.constant 0.000000e+00 : f32
    %20 = vector.broadcast %cst_17 : f32 to vector<8x32xf32>
    %21 = arith.maximumf %19, %20 : vector<8x32xf32>
    %c0_18 = arith.constant 0 : index
    %c0_19 = arith.constant 0 : index
    %22 = vector.load %arg8[%c0_18, %c0_19] : memref<32x128xf32, #tpu.memory_space<vmem>>, vector<32x128xf32>
    %cst_20 = arith.constant dense<0.000000e+00> : vector<8x128xf32>
    %23 = tpu.matmul %21, %22, %cst_20 {dimension_numbers = #tpu.dot_dimension_numbers<[1], [0], [0], [1], [0, 0, 1, 1], [], []>} : vector<8x32xf32>, vector<32x128xf32>, vector<8x128xf32> -> vector<8x128xf32>
    %c0_21 = arith.constant 0 : index
    %c0_22 = arith.constant 0 : index
    %24 = vector.load %arg9[%c0_21, %c0_22] : memref<1x128xf32, #tpu.memory_space<vmem>>, vector<1x128xf32>
    %25 = vector.broadcast %24 : vector<1x128xf32> to vector<8x128xf32>
    %26 = arith.addf %23, %25 : vector<8x128xf32>
    %c0_23 = arith.constant 0 : index
    %c0_24 = arith.constant 0 : index
    %27 = vector.load %arg10[%c0_23, %c0_24] : memref<8x128xf32, #tpu.memory_space<vmem>>, vector<8x128xf32>
    tpu.vector_store %arg10[%c0_23, %c0_24], %26 {strides = array<i32>} : memref<8x128xf32, #tpu.memory_space<vmem>>, vector<8x128xf32>,
    return
  }
  func.func @transform_0(%arg0: i32) -> (i32, i32) {
    %c0_i32 = arith.constant 0 : i32
    %c0_i32_0 = arith.constant 0 : i32
    return %arg0, %c0_i32 : i32, i32
  }
  func.func @transform_1(%arg0: i32) -> (i32, i32) {
    %c0_i32 = arith.constant 0 : i32
    %c0_i32_0 = arith.constant 0 : i32
    %c0_i32_1 = arith.constant 0 : i32
    return %c0_i32, %c0_i32_0 : i32, i32
  }
  func.func @transform_2(%arg0: i32) -> (i32, i32) {
    %c0_i32 = arith.constant 0 : i32
    %c0_i32_0 = arith.constant 0 : i32
    %c0_i32_1 = arith.constant 0 : i32
    return %c0_i32, %c0_i32_0 : i32, i32
  }
  func.func @transform_3(%arg0: i32) -> (i32, i32) {
    %c0_i32 = arith.constant 0 : i32
    %c0_i32_0 = arith.constant 0 : i32
    %c0_i32_1 = arith.constant 0 : i32
    return %c0_i32, %c0_i32_0 : i32, i32
  }
  func.func @transform_4(%arg0: i32) -> (i32, i32) {
    %c0_i32 = arith.constant 0 : i32
    %c0_i32_0 = arith.constant 0 : i32
    %c0_i32_1 = arith.constant 0 : i32
    return %c0_i32, %c0_i32_0 : i32, i32
  }
  func.func @transform_5(%arg0: i32) -> (i32, i32) {
    %c0_i32 = arith.constant 0 : i32
    %c0_i32_0 = arith.constant 0 : i32
    %c0_i32_1 = arith.constant 0 : i32
    return %c0_i32, %c0_i32_0 : i32, i32
  }
  func.func @transform_6(%arg0: i32) -> (i32, i32) {
    %c0_i32 = arith.constant 0 : i32
    %c0_i32_0 = arith.constant 0 : i32
    %c0_i32_1 = arith.constant 0 : i32
    return %c0_i32, %c0_i32_0 : i32, i32
  }
  func.func @transform_7(%arg0: i32) -> (i32, i32) {
    %c0_i32 = arith.constant 0 : i32
    %c0_i32_0 = arith.constant 0 : i32
    %c0_i32_1 = arith.constant 0 : i32
    return %c0_i32, %c0_i32_0 : i32, i32
  }
  func.func @transform_8(%arg0: i32) -> (i32, i32) {
    %c0_i32 = arith.constant 0 : i32
    %c0_i32_0 = arith.constant 0 : i32
    %c0_i32_1 = arith.constant 0 : i32
    return %c0_i32, %c0_i32_0 : i32, i32
  }
  func.func @transform_9(%arg0: i32) -> (i32, i32) {
    %c0_i32 = arith.constant 0 : i32
    %c0_i32_0 = arith.constant 0 : i32
    return %arg0, %c0_i32 : i32, i32
  }
}

</mosaic_0001>

<bundles_post_ra>
// kernel: dqn_forward.1
= control target key start
LH: loop header
LB: loop body
LE: loop exit
PB: predicated region body
PF: predicated region fallthrough
CT: control target
= control target key end

     0   :  { %v485_v0 = vmov 0.0   ;;  %vm486_vm0 = vmmov 0   ;;  %vm44_vm1 = vcmask 261120   ;;  %vm134_vm2 = vcmask 523264   ;;  %s663_s1 = inlined_call_operand.vmem [shape: f32[32,64], index: 1, kind: input, shape index: {}]   ;;  %s664_s3 = inlined_call_operand.vmem [shape: f32[64,64], index: 3, kind: input, shape index: {}]   ;;  %s665_s0 = inlined_call_operand.vmem [shape: f32[8,32], index: 0, kind: input, shape index: {}]   ;;  %s666_s5 = inlined_call_operand.vmem [shape: f32[64,32], index: 5, kind: input, shape index: {}]   ;;  %s667_s2 = inlined_call_operand.vmem [shape: f32[1,64], index: 2, kind: input, shape index: {}]   ;;  %s668_s7 = inlined_call_operand.vmem [shape: f32[32,128], index: 7, kind: input, shape index: {}]   ;;  %s669_s4 = inlined_call_operand.vmem [shape: f32[1,64], index: 4, kind: input, shape index: {}]   ;;  %s670_s6 = inlined_call_operand.vmem [shape: f32[1,32], index: 6, kind: input, shape index: {}]   ;;  %s671_s8 = inlined_call_operand.vmem [shape: f32[1,128], index: 8, kind: input, shape index: {}]   ;;  %s672_s9 = inlined_call_operand.vmem [shape: f32[8,128], index: 9, kind: output, shape index: {}]  }
   0x1   :  { %423 = vmatprep.subr.mxu0 %v485_v0  ;;  %v36_v1 = vld [vmem:[%s663_s1 + $0x18] sm:$0xff]  ;;  %v35_v2 = vld [vmem:[%s663_s1 + $0x10] sm:$0xff]  ;;  %431 = vmatprep.mubr.msk.f32.mxu0 %vm486_vm0, %v485_v0  ;;  %v34_v4 = vld [vmem:[%s663_s1 + $0x8] sm:$0xff] }
   0x2   :  { %424 = vmatpush3.msra.mxu0 %v36_v1  ;;  %434 = vmatprep.subr.mxu1 %v485_v0  ;;  %v126_v3 = vld [vmem:[%s664_s3 + $0x38] sm:$0xff]  ;;  %v125_v5 = vld [vmem:[%s664_s3 + $0x30] sm:$0xff]  ;;  %v124_v6 = vld [vmem:[%s664_s3 + $0x28] sm:$0xff] }
   0x3   :  { %425 = vmatprep.subr.mxu0 %v485_v0  ;;  %435 = vmatpush3.msra.mxu1 %v126_v3  ;;  %v33_v7 = vld [vmem:[%s663_s1] sm:$0xff]  ;;  %v122_v10 = vld [vmem:[%s664_s3 + $0x18] sm:$0xff]  ;;  %v121_v11 = vld [vmem:[%s664_s3 + $0x10] sm:$0xff] }
   0x4   :  { %426 = vmatpush3.msra.mxu0 %v35_v2  ;;  %436 = vmatprep.subr.mxu1 %v485_v0  ;;  %v32_v8 = vld [vmem:[%s665_s0] sm:$0xff]  ;;  %v120_v12 = vld [vmem:[%s664_s3 + $0x8] sm:$0xff]  ;;  %v216_v14 = vld [vmem:[%s666_s5 + $0x38] sm:$0xff] }
   0x5   :  { %427 = vmatprep.subr.mxu0 %v485_v0  ;;  %437 = vmatpush3.msra.mxu1 %v125_v5  ;;  %v123_v9 = vld [vmem:[%s664_s3 + $0x20] sm:$0xff]  ;;  %v215_v15 = vld [vmem:[%s666_s5 + $0x30] sm:$0xff]  ;;  %v214_v16 = vld [vmem:[%s666_s5 + $0x28] sm:$0xff] }
   0x6   :  { %428 = vmatpush3.msra.mxu0 %v34_v4  ;;  %438 = vmatprep.subr.mxu1 %v485_v0  ;;  %v119_v13 = vld [vmem:[%s664_s3] sm:$0xff]  ;;  %v212_v18 = vld [vmem:[%s666_s5 + $0x18] sm:$0xff]  ;;  %v211_v24 = vld [vmem:[%s666_s5 + $0x10] sm:$0xff] }
   0x7   :  { %429 = vmatprep.subr.mxu0 %v485_v0  ;;  %439 = vmatpush3.msra.mxu1 %v124_v6  ;;  %v213_v17 = vld [vmem:[%s666_s5 + $0x20] sm:$0xff]  ;;  %v210_v25 = vld [vmem:[%s666_s5 + $0x8] sm:$0xff]  ;;  %v301_v27 = vld [vmem:[%s668_s7 + $0x18] sm:$0xff] }
   0x8   :  { %430 = vmatpush3.msra.mxu0 %v33_v7  ;;  %440 = vmatprep.subr.mxu1 %v485_v0  ;;  %v387_v19 = vld [vmem:[%s667_s2] ss:$0 sm:$0xff]  ;;  %v300_v33 = vld [vmem:[%s668_s7 + $0x10] sm:$0xff]  ;;  %v299_v34 = vld [vmem:[%s668_s7 + $0x8] sm:$0xff] }
   0x9   :  { %432 = vmatmul.mubr.msk.f32.vlgmr.msra.gmra.mxu0 %vm44_vm1, %v32_v8  ;;  %441 = vmatpush3.msra.mxu1 %v123_v9  ;;  %v209_v26 = vld [vmem:[%s666_s5] sm:$0xff] }
   0xa   :  { %442 = vmatprep.subr.mxu1 %v485_v0  ;;  %450 = vmatprep.mubr.msk.f32.mxu1 %vm486_vm0, %v485_v0  ;;  %v389_v28 = vld [vmem:[%s669_s4] ss:$0 sm:$0xff] }
   0xb   :  { %443 = vmatpush3.msra.mxu1 %v122_v10  ;;  %453 = vmatprep.subr.mxu0 %v485_v0  ;;  %v298_v35 = vld [vmem:[%s668_s7] sm:$0xff] }
   0xc   :  { %444 = vmatprep.subr.mxu1 %v485_v0  ;;  %469 = vmatprep.mubr.msk.f32.mxu0 %vm486_vm0, %v485_v0  ;;  %v391_v36 = vld [vmem:[%s670_s6] ss:$0 sm:$0xff] }
   0xd   :  { %445 = vmatpush3.msra.mxu1 %v121_v11  ;;  %454 = vmatpush3.msra.mxu0 %v216_v14  ;;  %v393_v41 = vld [vmem:[%s671_s8] ss:$0 sm:$0xff] }
   0xe   :  { %446 = vmatprep.subr.mxu1 %v485_v0  ;;  %455 = vmatprep.subr.mxu0 %v485_v0 }
   0xf   :  { %447 = vmatpush3.msra.mxu1 %v120_v12  ;;  %456 = vmatpush3.msra.mxu0 %v215_v15 }
  0x10   :  { %448 = vmatprep.subr.mxu1 %v485_v0  ;;  %457 = vmatprep.subr.mxu0 %v485_v0 }
  0x11   :  { %449 = vmatpush3.msra.mxu1 %v119_v13  ;;  %458 = vmatpush3.msra.mxu0 %v214_v16 }
  0x12   :  { %472 = vmatprep.subr.mxu1 %v485_v0  ;;  %459 = vmatprep.subr.mxu0 %v485_v0 }
  0x13   :  { %460 = vmatpush3.msra.mxu0 %v213_v17 }
  0x14   :  { %461 = vmatprep.subr.mxu0 %v485_v0 }
  0x15   :  { %462 = vmatpush3.msra.mxu0 %v212_v18 }
  0x16   :  { %463 = vmatprep.subr.mxu0 %v485_v0 }
  0x17   :  { %464 = vmatpush3.msra.mxu0 %v211_v24 }
  0x18   :  { %465 = vmatprep.subr.mxu0 %v485_v0 }
  0x19   :  { %466 = vmatpush3.msra.mxu0 %v210_v25 }
  0x1a   :  { %467 = vmatprep.subr.mxu0 %v485_v0 }
  0x1b   :  { %468 = vmatpush3.msra.mxu0 %v209_v26 }
  0xc9   :  { %v114_v20 = vpop.f32.mrf.mxu0 }
  0xca   :  { %v115_v21 = vadd.f32 %v387_v19, %v114_v20 }
  0xcb   :  { %v433_v22 = vpop.f32.mrf.mxu0 }
  0xcc   :  { %v118_v23 = vmax.f32 %v115_v21, 0.0 }
  0xce   :  { %451 = vmatmul.mubr.msk.f32.vlgmr.msra.gmra.mxu1 %vm134_vm2, %v118_v23 }
  0xcf   :  { %480 = vmatprep.mubr.msk.f32.mxu1 %vm486_vm0, %v485_v0  ;;  %473 = vmatpush3.msra.mxu1 %v301_v27 }
  0xd0   :  { %474 = vmatprep.subr.mxu1 %v485_v0 }
  0xd1   :  { %475 = vmatpush3.msra.mxu1 %v300_v33 }
  0xd2   :  { %476 = vmatprep.subr.mxu1 %v485_v0 }
  0xd3   :  { %477 = vmatpush3.msra.mxu1 %v299_v34 }
  0xd4   :  { %478 = vmatprep.subr.mxu1 %v485_v0 }
  0xd5   :  { %479 = vmatpush3.msra.mxu1 %v298_v35 }
 0x18e   :  { %v204_v29 = vpop.f32.mrf.mxu1 }
 0x18f   :  { %v205_v30 = vadd.f32 %v389_v28, %v204_v29 }
 0x190   :  { %v452_v31 = vpop.f32.mrf.mxu1 }
 0x191   :  { %v208_v32 = vmax.f32 %v205_v30, 0.0 }
 0x193   :  { %470 = vmatmul.mubr.msk.f32.vlgmr.msra.gmra.mxu0 %vm134_vm2, %v208_v32 }
 0x253   :  { %v293_v37 = vpop.f32.mrf.mxu0 }
 0x254   :  { %v294_v38 = vadd.f32 %v391_v36, %v293_v37 }
 0x255   :  { %v471_v39 = vpop.f32.mrf.mxu0 }
 0x256   :  { %v297_v40 = vmax.f32 %v294_v38, 0.0 }
 0x258   :  { %481 = vmatmul.mubr.msk.f32.vlgmr.msra.gmra.mxu1 %vm44_vm1, %v297_v40 }
 0x318   :  { %v378_v42 = vpop.f32.mrf.mxu1 }
 0x319   :  { %v379_v43 = vadd.f32 %v393_v41, %v378_v42 }
 0x31a   :  { %v482_v44 = vpop.f32.mrf.mxu1 }
 0x31b   :  { %382 = vst [vmem:[%s672_s9] sm:$0xff] %v379_v43 }

</bundles_post_ra>
